<compile_context>
chip_gen: v7x
topology: tpu7x:2x2x1
jax: 0.10.0
libtpu: 0.0.40
codegen_flags: <defaults>
</compile_context>

<pallas_src>
import functools

import jax
import jax.numpy as jnp
from jax.experimental import pallas as pl
from jax.experimental.pallas import tpu as pltpu

MAX_ROWS_PER_BLOCK = 1024  # (3, 1024, 128) f32 = 1.5 MiB per block buffer


def _pick_row_block(rows):
    """Pick a sublane-row block size: multiple of 8 (or the full dim),
    capped at MAX_ROWS_PER_BLOCK, and small enough to give >= 2 grid steps
    along the row axis when possible (v7x megacore)."""
    if rows <= 8 or rows % 8 != 0:
        return rows  # full-dim block (allowed by the (8,128) rule)
    target = min(MAX_ROWS_PER_BLOCK, rows)
    if rows >= 16:
        target = min(target, rows // 2)  # ensure >= 2 row blocks
    return max(8, (target // 8) * 8)


def _fused_kernel(x_ref, p_ref, o_ref):
    # x_ref / o_ref: (3, R, L) VMEM slabs (N dim squeezed away).
    # p_ref: (24,) f32 in SMEM = [w1(9) | b1(3) | w2(9) | b2(3)], row-major.
    # Hoist all scalar reads once.
    w1 = [[p_ref[c * 3 + k] for k in range(3)] for c in range(3)]
    b1 = [p_ref[9 + c] for c in range(3)]
    w2 = [[p_ref[12 + c * 3 + k] for k in range(3)] for c in range(3)]
    b2 = [p_ref[21 + c] for c in range(3)]

    x0 = x_ref[0]
    x1 = x_ref[1]
    x2 = x_ref[2]

    def sigm(y):
        # sigmoid(y) = 0.5 * tanh(0.5 * y) + 0.5  (single EUP push + 2 VPU ops)
        return 0.5 * jnp.tanh(0.5 * y) + 0.5

    # layer 1: t_c = sigmoid(sum_k w1[c,k] * x_k + b1[c])   (unrolled VPU FMAs)
    t = []
    for c in range(3):
        y = w1[c][0] * x0 + w1[c][1] * x1 + w1[c][2] * x2 + b1[c]
        t.append(sigm(y))

    # layer 2 fused on the same tile: o_c = sigmoid(sum_k w2[c,k] * t_k + b2[c])
    for c in range(3):
        y = w2[c][0] * t[0] + w2[c][1] * t[1] + w2[c][2] * t[2] + b2[c]
        o_ref[c] = sigm(y)


def _fused_interior(x, packed):
    """Apply sigmoid(conv2(sigmoid(conv1(.)))) pixel-wise to the interior pixels.

    x: (N, 3, H, W) f32; packed: (24,) f32.  Returns (N, 3, H, W) f32.
    No transposes / pads: only free contiguous reshapes.
    """
    N, C, H, W = x.shape
    assert C == 3
    hw = H * W
    if hw % 128 == 0:
        lanes = 128
        rows = hw // 128
        xr = x.reshape(N, C, rows, lanes)      # contiguous reshape: free
    else:
        lanes = W                               # full-W lanes, ragged-safe
        rows = H
        xr = x

    rblk = _pick_row_block(rows)
    grid = (N, pl.cdiv(rows, rblk))

    block = pl.BlockSpec((None, C, rblk, lanes), lambda n, j: (n, 0, j, 0))
    y = pl.pallas_call(
        _fused_kernel,
        out_shape=jax.ShapeDtypeStruct((N, C, rows, lanes), jnp.float32),
        grid=grid,
        in_specs=[
            block,
            pl.BlockSpec(memory_space=pltpu.MemorySpace.SMEM),
        ],
        out_specs=block,
        compiler_params=pltpu.CompilerParams(
            dimension_semantics=("parallel", "parallel"),
        ),
    )(xr, packed)

    return y.reshape(N, C, H, W)


@functools.partial(jax.jit, static_argnums=(2,))
def model_forward(x, params, padding):
    """Forward pass of the PyTorch module (with configurable padding)."""
    w1, b1, w2, b2 = params
    N, C, H, W = x.shape
    p = padding

    w1m = w1.reshape(3, 3).astype(jnp.float32)
    w2m = w2.reshape(3, 3).astype(jnp.float32)
    b1v = b1.astype(jnp.float32)
    b2v = b2.astype(jnp.float32)
    packed = jnp.concatenate(
        [w1m.reshape(-1), b1v, w2m.reshape(-1), b2v]).astype(jnp.float32)

    # Interior pixels: both conv+sigmoid layers fused in one Pallas kernel.
    y_int = _fused_interior(x.astype(jnp.float32), packed)

    if p == 0:
        return y_int

    # Padding rings are per-channel constants (1x1 conv of a constant pixel):
    #   outermost ring (layer-2 zero padding, width p) -> sigmoid(b2)
    #   inner ring     (layer-1 zero padding, width p) -> sigmoid(W2 @ sigmoid(b1) + b2)
    outer_val = jax.nn.sigmoid(b2v)
    ring_val = jax.nn.sigmoid(w2m @ jax.nn.sigmoid(b1v) + b2v)

    # Single-pass assembly: per-channel nested lax.pad (interior -> ring -> outer).
    chans = []
    for c in range(3):
        yc = y_int[:, c]                                           # (N, H, W)
        yc = jax.lax.pad(yc, ring_val[c].astype(yc.dtype),
                         [(0, 0, 0), (p, p, 0), (p, p, 0)])
        yc = jax.lax.pad(yc, outer_val[c].astype(yc.dtype),
                         [(0, 0, 0), (p, p, 0), (p, p, 0)])
        chans.append(yc)
    return jnp.stack(chans, axis=1)                                # (N, 3, Hf, Wf)


def _reference(x, params, padding):
    """Pure-JAX reference (lax conv) for validation."""
    w1, b1, w2, b2 = params

    def conv_sig(inp, w, b):
        y = jax.lax.conv_general_dilated(
            inp, w, window_strides=(1, 1),
            padding=[(padding, padding), (padding, padding)],
            dimension_numbers=("NCHW", "OIHW", "NCHW"))
        return jax.nn.sigmoid(y + b.reshape(1, -1, 1, 1))

    return conv_sig(conv_sig(x, w1, b1), w2, b2)


def init_params(key):
    # Conv2d(3, 3, kernel_size=1): uniform(-1/sqrt(fan_in), 1/sqrt(fan_in))
    k1, k2, k3, k4 = jax.random.split(key, 4)
    bound = 1.0 / jnp.sqrt(3.0)
    w1 = jax.random.uniform(k1, (3, 3, 1, 1), jnp.float32, -bound, bound)
    b1 = jax.random.uniform(k2, (3,), jnp.float32, -bound, bound)
    w2 = jax.random.uniform(k3, (3, 3, 1, 1), jnp.float32, -bound, bound)
    b2 = jax.random.uniform(k4, (3,), jnp.float32, -bound, bound)
    return w1, b1, w2, b2


if __name__ == "__main__":
    key = jax.random.PRNGKey(0)
    k_x, k_p = jax.random.split(key)

    # TODO(synk): original module uses padding=1000000 (output unmaterializable);
    # demo uses padding=2 with a small image.
    N, C, H, W = 2, 3, 64, 64
    PADDING = 2
    x = jax.random.normal(k_x, (N, C, H, W), dtype=jnp.float32)
    params = init_params(k_p)

    out = jax.block_until_ready(model_forward(x, params, PADDING))
    expected_shape = (N, 3, H + 4 * PADDING, W + 4 * PADDING)
    assert out.shape == expected_shape, (out.shape, expected_shape)

    ref = jax.block_until_ready(_reference(x, params, PADDING))
    assert jnp.allclose(out, ref, atol=2e-5, rtol=2e-5), \
        float(jnp.max(jnp.abs(out - ref)))

    # Ragged path: H*W not a multiple of 128 (exercises the no-pad blocking).
    x2 = jax.random.normal(k_x, (1, 3, 20, 20), dtype=jnp.float32)
    out2 = jax.block_until_ready(model_forward(x2, params, 1))
    ref2 = jax.block_until_ready(_reference(x2, params, 1))
    assert out2.shape == (1, 3, 24, 24), out2.shape
    assert jnp.allclose(out2, ref2, atol=2e-5, rtol=2e-5), \
        float(jnp.max(jnp.abs(out2 - ref2)))

    print("KERNEL_OK")
</pallas_src>

<mosaic_0001>
module attributes {stable_mosaic.version = 11 : i64} {
  func.func @_fused_kernel(%arg0: i32, %arg1: i32, %arg2: memref<1x3x16x128xf32, #tpu.memory_space<vmem>>, %arg3: memref<24xf32, #tpu.memory_space<smem>>, %arg4: memref<1x3x16x128xf32, #tpu.memory_space<vmem>>) attributes {dimension_semantics = [#tpu.dimension_semantics<parallel>, #tpu.dimension_semantics<parallel>], iteration_bounds = array<i64: 2, 2>, scalar_prefetch = 0 : i64, scratch_operands = 0 : i64, tpu.core_type = #tpu.core_type<tc>, window_params = [{transform_indices = @transform_0, window_bounds = array<i64: 1, 3, 16, 128>}, {transform_indices = @transform_1, window_bounds = array<i64: 24>}, {transform_indices = @transform_2, window_bounds = array<i64: 1, 3, 16, 128>}]} {
    %c0 = arith.constant 0 : index
    %0 = memref.load %arg3[%c0] : memref<24xf32, #tpu.memory_space<smem>>
    %c1 = arith.constant 1 : index
    %1 = memref.load %arg3[%c1] : memref<24xf32, #tpu.memory_space<smem>>
    %c2 = arith.constant 2 : index
    %2 = memref.load %arg3[%c2] : memref<24xf32, #tpu.memory_space<smem>>
    %c3 = arith.constant 3 : index
    %3 = memref.load %arg3[%c3] : memref<24xf32, #tpu.memory_space<smem>>
    %c4 = arith.constant 4 : index
    %4 = memref.load %arg3[%c4] : memref<24xf32, #tpu.memory_space<smem>>
    %c5 = arith.constant 5 : index
    %5 = memref.load %arg3[%c5] : memref<24xf32, #tpu.memory_space<smem>>
    %c6 = arith.constant 6 : index
    %6 = memref.load %arg3[%c6] : memref<24xf32, #tpu.memory_space<smem>>
    %c7 = arith.constant 7 : index
    %7 = memref.load %arg3[%c7] : memref<24xf32, #tpu.memory_space<smem>>
    %c8 = arith.constant 8 : index
    %8 = memref.load %arg3[%c8] : memref<24xf32, #tpu.memory_space<smem>>
    %c9 = arith.constant 9 : index
    %9 = memref.load %arg3[%c9] : memref<24xf32, #tpu.memory_space<smem>>
    %c10 = arith.constant 10 : index
    %10 = memref.load %arg3[%c10] : memref<24xf32, #tpu.memory_space<smem>>
    %c11 = arith.constant 11 : index
    %11 = memref.load %arg3[%c11] : memref<24xf32, #tpu.memory_space<smem>>
    %c12 = arith.constant 12 : index
    %12 = memref.load %arg3[%c12] : memref<24xf32, #tpu.memory_space<smem>>
    %c13 = arith.constant 13 : index
    %13 = memref.load %arg3[%c13] : memref<24xf32, #tpu.memory_space<smem>>
    %c14 = arith.constant 14 : index
    %14 = memref.load %arg3[%c14] : memref<24xf32, #tpu.memory_space<smem>>
    %c15 = arith.constant 15 : index
    %15 = memref.load %arg3[%c15] : memref<24xf32, #tpu.memory_space<smem>>
    %c16 = arith.constant 16 : index
    %16 = memref.load %arg3[%c16] : memref<24xf32, #tpu.memory_space<smem>>
    %c17 = arith.constant 17 : index
    %17 = memref.load %arg3[%c17] : memref<24xf32, #tpu.memory_space<smem>>
    %c18 = arith.constant 18 : index
    %18 = memref.load %arg3[%c18] : memref<24xf32, #tpu.memory_space<smem>>
    %c19 = arith.constant 19 : index
    %19 = memref.load %arg3[%c19] : memref<24xf32, #tpu.memory_space<smem>>
    %c20 = arith.constant 20 : index
    %20 = memref.load %arg3[%c20] : memref<24xf32, #tpu.memory_space<smem>>
    %c21 = arith.constant 21 : index
    %21 = memref.load %arg3[%c21] : memref<24xf32, #tpu.memory_space<smem>>
    %c22 = arith.constant 22 : index
    %22 = memref.load %arg3[%c22] : memref<24xf32, #tpu.memory_space<smem>>
    %c23 = arith.constant 23 : index
    %23 = memref.load %arg3[%c23] : memref<24xf32, #tpu.memory_space<smem>>
    %c0_0 = arith.constant 0 : index
    %c0_1 = arith.constant 0 : index
    %c0_2 = arith.constant 0 : index
    %c0_3 = arith.constant 0 : index
    %24 = vector.load %arg2[%c0_0, %c0_1, %c0_2, %c0_3] : memref<1x3x16x128xf32, #tpu.memory_space<vmem>>, vector<1x1x16x128xf32>
    %25 = vector.shape_cast %24 : vector<1x1x16x128xf32> to vector<16x128xf32>
    %c0_4 = arith.constant 0 : index
    %c1_5 = arith.constant 1 : index
    %c0_6 = arith.constant 0 : index
    %c0_7 = arith.constant 0 : index
    %26 = vector.load %arg2[%c0_4, %c1_5, %c0_6, %c0_7] : memref<1x3x16x128xf32, #tpu.memory_space<vmem>>, vector<1x1x16x128xf32>
    %27 = vector.shape_cast %26 : vector<1x1x16x128xf32> to vector<16x128xf32>
    %c0_8 = arith.constant 0 : index
    %c2_9 = arith.constant 2 : index
    %c0_10 = arith.constant 0 : index
    %c0_11 = arith.constant 0 : index
    %28 = vector.load %arg2[%c0_8, %c2_9, %c0_10, %c0_11] : memref<1x3x16x128xf32, #tpu.memory_space<vmem>>, vector<1x1x16x128xf32>
    %29 = vector.shape_cast %28 : vector<1x1x16x128xf32> to vector<16x128xf32>
    %30 = vector.broadcast %0 : f32 to vector<16x128xf32>
    %31 = arith.mulf %30, %25 : vector<16x128xf32>
    %32 = vector.broadcast %1 : f32 to vector<16x128xf32>
    %33 = arith.mulf %32, %27 : vector<16x128xf32>
    %34 = arith.addf %31, %33 : vector<16x128xf32>
    %35 = vector.broadcast %2 : f32 to vector<16x128xf32>
    %36 = arith.mulf %35, %29 : vector<16x128xf32>
    %37 = arith.addf %34, %36 : vector<16x128xf32>
    %38 = vector.broadcast %9 : f32 to vector<16x128xf32>
    %39 = arith.addf %37, %38 : vector<16x128xf32>
    %cst = arith.constant 5.000000e-01 : f32
    %40 = vector.broadcast %cst : f32 to vector<16x128xf32>
    %41 = arith.mulf %40, %39 : vector<16x128xf32>
    %42 = math.tanh %41 : vector<16x128xf32>
    %cst_12 = arith.constant 5.000000e-01 : f32
    %43 = vector.broadcast %cst_12 : f32 to vector<16x128xf32>
    %44 = arith.mulf %43, %42 : vector<16x128xf32>
    %cst_13 = arith.constant 5.000000e-01 : f32
    %45 = vector.broadcast %cst_13 : f32 to vector<16x128xf32>
    %46 = arith.addf %44, %45 : vector<16x128xf32>
    %47 = vector.broadcast %3 : f32 to vector<16x128xf32>
    %48 = arith.mulf %47, %25 : vector<16x128xf32>
    %49 = vector.broadcast %4 : f32 to vector<16x128xf32>
    %50 = arith.mulf %49, %27 : vector<16x128xf32>
    %51 = arith.addf %48, %50 : vector<16x128xf32>
    %52 = vector.broadcast %5 : f32 to vector<16x128xf32>
    %53 = arith.mulf %52, %29 : vector<16x128xf32>
    %54 = arith.addf %51, %53 : vector<16x128xf32>
    %55 = vector.broadcast %10 : f32 to vector<16x128xf32>
    %56 = arith.addf %54, %55 : vector<16x128xf32>
    %cst_14 = arith.constant 5.000000e-01 : f32
    %57 = vector.broadcast %cst_14 : f32 to vector<16x128xf32>
    %58 = arith.mulf %57, %56 : vector<16x128xf32>
    %59 = math.tanh %58 : vector<16x128xf32>
    %cst_15 = arith.constant 5.000000e-01 : f32
    %60 = vector.broadcast %cst_15 : f32 to vector<16x128xf32>
    %61 = arith.mulf %60, %59 : vector<16x128xf32>
    %cst_16 = arith.constant 5.000000e-01 : f32
    %62 = vector.broadcast %cst_16 : f32 to vector<16x128xf32>
    %63 = arith.addf %61, %62 : vector<16x128xf32>
    %64 = vector.broadcast %6 : f32 to vector<16x128xf32>
    %65 = arith.mulf %64, %25 : vector<16x128xf32>
    %66 = vector.broadcast %7 : f32 to vector<16x128xf32>
    %67 = arith.mulf %66, %27 : vector<16x128xf32>
    %68 = arith.addf %65, %67 : vector<16x128xf32>
    %69 = vector.broadcast %8 : f32 to vector<16x128xf32>
    %70 = arith.mulf %69, %29 : vector<16x128xf32>
    %71 = arith.addf %68, %70 : vector<16x128xf32>
    %72 = vector.broadcast %11 : f32 to vector<16x128xf32>
    %73 = arith.addf %71, %72 : vector<16x128xf32>
    %cst_17 = arith.constant 5.000000e-01 : f32
    %74 = vector.broadcast %cst_17 : f32 to vector<16x128xf32>
    %75 = arith.mulf %74, %73 : vector<16x128xf32>
    %76 = math.tanh %75 : vector<16x128xf32>
    %cst_18 = arith.constant 5.000000e-01 : f32
    %77 = vector.broadcast %cst_18 : f32 to vector<16x128xf32>
    %78 = arith.mulf %77, %76 : vector<16x128xf32>
    %cst_19 = arith.constant 5.000000e-01 : f32
    %79 = vector.broadcast %cst_19 : f32 to vector<16x128xf32>
    %80 = arith.addf %78, %79 : vector<16x128xf32>
    %81 = vector.broadcast %12 : f32 to vector<16x128xf32>
    %82 = arith.mulf %81, %46 : vector<16x128xf32>
    %83 = vector.broadcast %13 : f32 to vector<16x128xf32>
    %84 = arith.mulf %83, %63 : vector<16x128xf32>
    %85 = arith.addf %82, %84 : vector<16x128xf32>
    %86 = vector.broadcast %14 : f32 to vector<16x128xf32>
    %87 = arith.mulf %86, %80 : vector<16x128xf32>
    %88 = arith.addf %85, %87 : vector<16x128xf32>
    %89 = vector.broadcast %21 : f32 to vector<16x128xf32>
    %90 = arith.addf %88, %89 : vector<16x128xf32>
    %cst_20 = arith.constant 5.000000e-01 : f32
    %91 = vector.broadcast %cst_20 : f32 to vector<16x128xf32>
    %92 = arith.mulf %91, %90 : vector<16x128xf32>
    %93 = math.tanh %92 : vector<16x128xf32>
    %cst_21 = arith.constant 5.000000e-01 : f32
    %94 = vector.broadcast %cst_21 : f32 to vector<16x128xf32>
    %95 = arith.mulf %94, %93 : vector<16x128xf32>
    %cst_22 = arith.constant 5.000000e-01 : f32
    %96 = vector.broadcast %cst_22 : f32 to vector<16x128xf32>
    %97 = arith.addf %95, %96 : vector<16x128xf32>
    %c0_23 = arith.constant 0 : index
    %c0_24 = arith.constant 0 : index
    %c0_25 = arith.constant 0 : index
    %c0_26 = arith.constant 0 : index
    %98 = vector.load %arg4[%c0_23, %c0_24, %c0_25, %c0_26] : memref<1x3x16x128xf32, #tpu.memory_space<vmem>>, vector<1x1x16x128xf32>
    %99 = vector.shape_cast %98 : vector<1x1x16x128xf32> to vector<16x128xf32>
    %100 = vector.shape_cast %97 : vector<16x128xf32> to vector<1x1x16x128xf32>
    tpu.vector_store %arg4[%c0_23, %c0_24, %c0_25, %c0_26], %100 {strides = array<i32>} : memref<1x3x16x128xf32, #tpu.memory_space<vmem>>, vector<1x1x16x128xf32>,
    %101 = vector.broadcast %15 : f32 to vector<16x128xf32>
    %102 = arith.mulf %101, %46 : vector<16x128xf32>
    %103 = vector.broadcast %16 : f32 to vector<16x128xf32>
    %104 = arith.mulf %103, %63 : vector<16x128xf32>
    %105 = arith.addf %102, %104 : vector<16x128xf32>
    %106 = vector.broadcast %17 : f32 to vector<16x128xf32>
    %107 = arith.mulf %106, %80 : vector<16x128xf32>
    %108 = arith.addf %105, %107 : vector<16x128xf32>
    %109 = vector.broadcast %22 : f32 to vector<16x128xf32>
    %110 = arith.addf %108, %109 : vector<16x128xf32>
    %cst_27 = arith.constant 5.000000e-01 : f32
    %111 = vector.broadcast %cst_27 : f32 to vector<16x128xf32>
    %112 = arith.mulf %111, %110 : vector<16x128xf32>
    %113 = math.tanh %112 : vector<16x128xf32>
    %cst_28 = arith.constant 5.000000e-01 : f32
    %114 = vector.broadcast %cst_28 : f32 to vector<16x128xf32>
    %115 = arith.mulf %114, %113 : vector<16x128xf32>
    %cst_29 = arith.constant 5.000000e-01 : f32
    %116 = vector.broadcast %cst_29 : f32 to vector<16x128xf32>
    %117 = arith.addf %115, %116 : vector<16x128xf32>
    %c0_30 = arith.constant 0 : index
    %c1_31 = arith.constant 1 : index
    %c0_32 = arith.constant 0 : index
    %c0_33 = arith.constant 0 : index
    %118 = vector.load %arg4[%c0_30, %c1_31, %c0_32, %c0_33] : memref<1x3x16x128xf32, #tpu.memory_space<vmem>>, vector<1x1x16x128xf32>
    %119 = vector.shape_cast %118 : vector<1x1x16x128xf32> to vector<16x128xf32>
    %120 = vector.shape_cast %117 : vector<16x128xf32> to vector<1x1x16x128xf32>
    tpu.vector_store %arg4[%c0_30, %c1_31, %c0_32, %c0_33], %120 {strides = array<i32>} : memref<1x3x16x128xf32, #tpu.memory_space<vmem>>, vector<1x1x16x128xf32>,
    %121 = vector.broadcast %18 : f32 to vector<16x128xf32>
    %122 = arith.mulf %121, %46 : vector<16x128xf32>
    %123 = vector.broadcast %19 : f32 to vector<16x128xf32>
    %124 = arith.mulf %123, %63 : vector<16x128xf32>
    %125 = arith.addf %122, %124 : vector<16x128xf32>
    %126 = vector.broadcast %20 : f32 to vector<16x128xf32>
    %127 = arith.mulf %126, %80 : vector<16x128xf32>
    %128 = arith.addf %125, %127 : vector<16x128xf32>
    %129 = vector.broadcast %23 : f32 to vector<16x128xf32>
    %130 = arith.addf %128, %129 : vector<16x128xf32>
    %cst_34 = arith.constant 5.000000e-01 : f32
    %131 = vector.broadcast %cst_34 : f32 to vector<16x128xf32>
    %132 = arith.mulf %131, %130 : vector<16x128xf32>
    %133 = math.tanh %132 : vector<16x128xf32>
    %cst_35 = arith.constant 5.000000e-01 : f32
    %134 = vector.broadcast %cst_35 : f32 to vector<16x128xf32>
    %135 = arith.mulf %134, %133 : vector<16x128xf32>
    %cst_36 = arith.constant 5.000000e-01 : f32
    %136 = vector.broadcast %cst_36 : f32 to vector<16x128xf32>
    %137 = arith.addf %135, %136 : vector<16x128xf32>
    %c0_37 = arith.constant 0 : index
    %c2_38 = arith.constant 2 : index
    %c0_39 = arith.constant 0 : index
    %c0_40 = arith.constant 0 : index
    %138 = vector.load %arg4[%c0_37, %c2_38, %c0_39, %c0_40] : memref<1x3x16x128xf32, #tpu.memory_space<vmem>>, vector<1x1x16x128xf32>
    %139 = vector.shape_cast %138 : vector<1x1x16x128xf32> to vector<16x128xf32>
    %140 = vector.shape_cast %137 : vector<16x128xf32> to vector<1x1x16x128xf32>
    tpu.vector_store %arg4[%c0_37, %c2_38, %c0_39, %c0_40], %140 {strides = array<i32>} : memref<1x3x16x128xf32, #tpu.memory_space<vmem>>, vector<1x1x16x128xf32>,
    return
  }
  func.func @transform_0(%arg0: i32, %arg1: i32) -> (i32, i32, i32, i32) {
    %c0_i32 = arith.constant 0 : i32
    %c0_i32_0 = arith.constant 0 : i32
    %c0_i32_1 = arith.constant 0 : i32
    return %arg0, %c0_i32, %arg1, %c0_i32_0 : i32, i32, i32, i32
  }
  func.func @transform_1(%arg0: i32, %arg1: i32) -> i32 {
    %c0_i32 = arith.constant 0 : i32
    %c0_i32_0 = arith.constant 0 : i32
    return %c0_i32 : i32
  }
  func.func @transform_2(%arg0: i32, %arg1: i32) -> (i32, i32, i32, i32) {
    %c0_i32 = arith.constant 0 : i32
    %c0_i32_0 = arith.constant 0 : i32
    %c0_i32_1 = arith.constant 0 : i32
    return %arg0, %c0_i32, %arg1, %c0_i32_0 : i32, i32, i32, i32
  }
}

</mosaic_0001>

<bundles_post_ra>
// kernel: model_forward.1
= control target key start
LH: loop header
LB: loop body
LE: loop exit
PB: predicated region body
PF: predicated region fallthrough
CT: control target
= control target key end

     0   :  { %7 = vsyncpa [#allocation4], 0  ;;  %s791_s9 = smov 0   ;;  %s793_s10 = smov 0   ;;  %s998_s0 = inlined_call_operand.vmem [shape: f32[2,3,32,128], index: 0, kind: input, shape index: {}]   ;;  %s999_s1 = inlined_call_operand.vmem [shape: f32[24], index: 1, kind: input, shape index: {}]   ;;  %s1000_s2 = inlined_call_operand.vmem [shape: f32[2,3,32,128], index: 2, kind: output, shape index: {}]  }
   0x1   :  { %s795_s11 = smov 0   ;;  %s797_s12 = smov 0  }
   0x2   :  { %s799_s13 = smov 0   ;;  %s801_s14 = smov 0  }
   0x3   :  { %s803_s15 = smov 0  }
   0x4 LB: > { %s561_s16 = sadd.s32 4294967295, %s773_s15   ;;  %s22_s17 = sadd.s32 1, %s765_s13  ;;  %s773_s15 = sphi %s803_s15, %s13_s15   ;;  %s769_s14 = sphi %s801_s14, %s1013_s14   ;;  %s765_s13 = sphi %s799_s13, %s1012_s13   ;;  %s761_s12 = sphi %s797_s12, %s1011_s12   ;;  %s757_s11 = sphi %s795_s11, %s1010_s11   ;;  %s753_s10 = sphi %s793_s10, %s1009_s10   ;;  %s749_s9 = sphi %s791_s9, %s1008_s9  }
   0x5   : > { %p23_p0 = scmp.ge.s32.totalorder %s22_s17, 2  ;;  %s25_s18 = sadd.s32 1, %s769_s14 }
   0x6   : > { %s34_s19 = sadd.s32 1, %s753_s10  ;;  %p41_p1 = scmp.ne.s32.totalorder %s753_s10, %s749_s9 }
   0x7   : > { %s1015_s17 = smov (%p23_p0, %s22_s17), 0  ;;  %s1017_s18 = smov (!%p23_p0, %s25_s18), %s769_s14 }
   0x8   : > { %s30_s20 = ssub.s32 %s765_s13, %s1015_s17  ;;  %p42_p2 = scmp.eq.s32.totalorder %s773_s15, 0 }
   0x9   : > { %p27_p3 = scmp.ge.s32.totalorder %s1017_s18, 2  ;;  %p94_p4 = scmp.eq.s32.totalorder %s561_s16, 3 }
   0xa   : > { %p838_p5 = por %p42_p2, %p41_p1  ;;  %p563_p6 = scmp.ge.s32.totalorder %s773_s15, 1 }
   0xb   : > { %s1019_s18 = smov (%p27_p3, %s1017_s18), 0  ;;  %p845_p7 = por %p94_p4, %p41_p1 }
   0xc   : > { %p107_p8 = scmp.lt.s32.totalorder %s773_s15, 5  ;;  %s29_s23 = ssub.s32 %s769_s14, %s1019_s18 }
   0xd   : > { %s1003_s22 = scalar_select %p845_p7, 1, 0 }
   0xe   : > { %s31_s24 = sor.u32 %s30_s20, %s29_s23  ;;  %p852_p9 = pnand %p563_p6, %p107_p8 }
   0xf   : > { %p32_p10 = scmp.eq.s32.totalorder %s31_s24, 0  ;;  %p856_p11 = scmp.eq.s32.totalorder %s561_s16, 0 }
  0x10   : > { %s1004_s25 = scalar_select %p852_p9, 1, 0 }
  0x11   : > { %p613_p12 = pneg %p852_p9  ;;  %s120_s29 = sshll.u32 %s999_s1, 4  ;;  %s121_s29 = int_to_ptr.vmem [resolvable:$true] %s120_s29 }
  0x12   : > { %s866_s30 = scalar_select %p32_p10, %s753_s10, %s34_s19  }
  0x13   : > { %p614_p13 = pnand %p856_p11, %p613_p12  ;;  %s700_s3 = scalar_lea.vmem %s121_s29, 16 }
  0x14   : > { %p701_p0 = scmp.ne.s32.totalorder %s121_s29, %s700_s3  ;;  %p708_p4 = scmp.lt.s32.totalorder %s121_s29, %s121_s29 }
  0x15   : > { %p702_p1 = pneg %p614_p13  ;;  %p709_p6 = scmp.lt.s32.totalorder %s700_s3, %s700_s3 }
  0x17   : > { %p703_p2 = pnand %p702_p1, %p701_p0  ;;  %p710_p8 = por %p709_p6, %p708_p4 }
  0x19   : > { %p704_p3 = pneg %p703_p2 }
  0x1b   : > { %p711_p7 = pnand %p710_p8, %p704_p3 }
  0x1d   : > { %714 = shalt.err (!%p711_p7)
}
  0x1e   : > { %s775_s4 = smov [#allocation3]   ;;  %p565_p9 = scmp.ge.s32.totalorder %s773_s15, 4 }
  0x1f   : > { %616 = dma.vmem_to_smem (!%p614_p13), %s121_s29, 16, %s775_s4, [#allocation4]  }
  0x20   : > { %127 = sbr.rel (%p565_p9) target bundleno = 50 (0x32), region = 20 }
  0x27   : > { %130 = sbr.rel (!%p838_p5) target bundleno = 50 (0x32), region = 24  ;;  %s132_s5 = sand.u32 (%p838_p5), 1, %s753_s10  }
  0x28   : > { %s605_s6 = smul.u32 (%p838_p5), 48, %s132_s5  ;;  %s566_s7 = sshll.u32 (%p838_p5), %s765_s13, 1 }
  0x29   : > { %s606_s8 = smul.u32 (%p838_p5), 12, %s769_s14 }
  0x2a   : > { %s134_s27 = scalar_lea.vmem (%p838_p5), [#allocation2], %s605_s6 }
  0x2b   : > { %s137_s16 = sadd.s32 (%p838_p5), %s606_s8, %s566_s7 }
  0x2c   : > { %s567_s19 = sshll.u32 (%p838_p5), %s137_s16, 3 }
  0x2d   : > { %s139_s24 = scalar_lea.vmem (%p838_p5), %s998_s0, %s567_s19 }
  0x2e   : > { %v177_v0 = vld [vmem:[%s139_s24] sm:$0xff]  ;;  %v179_v1 = vld [vmem:[%s139_s24 + $0x8] sm:$0xff] }
  0x2f   : > { %v181_v2 = vld [vmem:[%s139_s24 + $0x20] sm:$0xff]  ;;  %178 = vst [vmem:[%s134_s27] sm:$0xff] %v177_v0  ;;  %180 = vst [vmem:[%s134_s27 + $0x8] sm:$0xff] %v179_v1  ;;  %v183_v3 = vld [vmem:[%s139_s24 + $0x28] sm:$0xff] }
  0x30   : > { %182 = vst [vmem:[%s134_s27 + $0x10] sm:$0xff] %v181_v2  ;;  %v185_v4 = vld [vmem:[%s139_s24 + $0x40] sm:$0xff]  ;;  %v187_v5 = vld [vmem:[%s139_s24 + $0x48] sm:$0xff]  ;;  %184 = vst [vmem:[%s134_s27 + $0x18] sm:$0xff] %v183_v3 }
  0x31   : > { %186 = vst [vmem:[%s134_s27 + $0x20] sm:$0xff] %v185_v4  ;;  %188 = vst [vmem:[%s134_s27 + $0x28] sm:$0xff] %v187_v5 }
  0x32 PF: > { %p1006_p5 = scmp.ne.s32.totalorder %s1004_s25, 0 }
  0x33   : > { %s200_s21 = sand.u32 (!%p1006_p5), 1, %s749_s9  }
  0x34   : > { %197 = sbr.rel (%p1006_p5) target bundleno = 137 (0x89), region = 62 }
  0x35   : > { %s882_s28 = smul.u32 (!%p1006_p5), 48, %s200_s21 }
  0x37   : > { %s885_s29 = scalar_lea.vmem (!%p1006_p5), [#allocation2], %s882_s28 }
  0x3b   : > { %744 = dma.done.wait (%p856_p11), [#allocation4], 16  }
  0x3c   : > { %746 = vsyncadd (%p856_p11), [#allocation4], 4294967280 }
  0x3d   : > { %210 = sfence }
  0x3e   : > { %s891_s3 = sld [smem:[#allocation3]]  ;;  %s893_s25 = sld [smem:[#allocation3 + $0x1]]  ;;  %v251_v6 = vld [vmem:[%s885_s29] sm:$0xff]  ;;  %v593_v7 = vld [vmem:[%s885_s29 + $0x10] sm:$0xff]  ;;  %v252_v21 = vld [vmem:[%s885_s29 + $0x8] sm:$0xff] }
  0x3f   : > { %s895_s9 = sld [smem:[#allocation3 + $0x2]]  ;;  %s897_s4 = sld [smem:[#allocation3 + $0x3]]  ;;  %v595_v8 = vld [vmem:[%s885_s29 + $0x20] sm:$0xff]  ;;  %v594_v29 = vld [vmem:[%s885_s29 + $0x18] sm:$0xff]  ;;  %v596_v33 = vld [vmem:[%s885_s29 + $0x28] sm:$0xff] }
  0x40   : > { %s899_s5 = sld [smem:[#allocation3 + $0x4]]  ;;  %s901_s6 = sld [smem:[#allocation3 + $0x5]] }
  0x41   : > { %s903_s26 = sld [smem:[#allocation3 + $0x6]]  ;;  %s905_s7 = sld [smem:[#allocation3 + $0x7]] }
  0x42   : > { %s907_s8 = sld [smem:[#allocation3 + $0x8]]  ;;  %s910_s16 = sld [smem:[#allocation3 + $0x9]] }
  0x43   : > { %s912_s19 = sld [smem:[#allocation3 + $0xa]]  ;;  %s916_s20 = sld [smem:[#allocation3 + $0xb]] }
  0x44   : > { %v259_v9 = vstv %s891_s3  ;;  %v262_v11 = vstv %s893_s25  ;;  %s933_s23 = sld [smem:[#allocation3 + $0xc]]  ;;  %s935_s24 = sld [smem:[#allocation3 + $0xd]] }
  0x45   : > { %v260_v10 = vmul.f32 %v259_v9, %v251_v6  ;;  %v267_v12 = vstv %s895_s9  ;;  %v263_v13 = vmul.f32 %v593_v7, %v262_v11  ;;  %v283_v15 = vstv %s897_s4  ;;  %s937_s27 = sld [smem:[#allocation3 + $0xf]]  ;;  %s939_s21 = sld [smem:[#allocation3 + $0x12]] }
  0x46   : > { %v268_v14 = vmul.f32 %v595_v8, %v267_v12  ;;  %v286_v16 = vstv %s899_s5  ;;  %v284_v17 = vmul.f32 %v283_v15, %v251_v6  ;;  %v291_v19 = vstv %s901_s6  ;;  %s941_s29 = sld [smem:[#allocation3 + $0x10]]  ;;  %s943_s3 = sld [smem:[#allocation3 + $0x13]] }
  0x47   : > { %v287_v18 = vmul.f32 %v593_v7, %v286_v16  ;;  %v307_v20 = vstv %s903_s26  ;;  %v265_v22 = vadd.f32 %v263_v13, %v260_v10  ;;  %v292_v23 = vmul.f32 %v595_v8, %v291_v19  ;;  %s945_s25 = sld [smem:[#allocation3 + $0xe]]  ;;  %s947_s9 = sld [smem:[#allocation3 + $0x11]] }
  0x48   : > { %v308_v24 = vmul.f32 %v307_v20, %v251_v6  ;;  %v310_v25 = vstv %s905_s7  ;;  %v272_v26 = vstv %s910_s16  ;;  %v315_v32 = vstv %s907_s8  ;;  %s949_s4 = sld [smem:[#allocation3 + $0x14]]  ;;  %s951_s5 = sld [smem:[#allocation3 + $0x15]] }
  0x49   : > { %v289_v27 = vadd.f32 %v287_v18, %v284_v17  ;;  %v311_v28 = vmul.f32 %v593_v7, %v310_v25  ;;  %v270_v30 = vadd.f32 %v268_v14, %v265_v22  ;;  %v296_v31 = vstv %s912_s19  ;;  %s953_s6 = sld [smem:[#allocation3 + $0x16]]  ;;  %s957_s26 = sld [smem:[#allocation3 + $0x17]] }
  0x4a   : > { %v261_v34 = vmul.f32 %v259_v9, %v252_v21  ;;  %v316_v37 = vmul.f32 %v595_v8, %v315_v32  ;;  %v320_v39 = vstv %s916_s20  ;;  %v264_v40 = vmul.f32 %v594_v29, %v262_v11  ;;  %s224_s7 = scalar_lea.vmem [#allocation5], %s882_s28  ;;  %p1007_p7 = scmp.ne.s32.totalorder %s1003_s22, 0 }
  0x4b   : > { %v294_v35 = vadd.f32 %v292_v23, %v289_v27  ;;  %v313_v36 = vadd.f32 %v311_v28, %v308_v24  ;;  %v273_v38 = vadd.f32 %v272_v26, %v270_v30  ;;  %v269_v43 = vmul.f32 %v596_v33, %v267_v12  ;;  %s601_s28 = sshll.u32 (%p1007_p7), %s757_s11, 1  ;;  %s608_s8 = smul.u32 (%p1007_p7), 12, %s761_s12 }
  0x4c   : > { %v285_v44 = vmul.f32 %v283_v15, %v252_v21  ;;  %v266_v46 = vadd.f32 %v264_v40, %v261_v34  ;;  %v288_v47 = vmul.f32 %v594_v29, %v286_v16  ;;  %v293_v48 = vmul.f32 %v596_v33, %v291_v19 }
  0x4d   : > { %v297_v41 = vadd.f32 %v296_v31, %v294_v35  ;;  %v318_v42 = vadd.f32 %v316_v37, %v313_v36  ;;  %v275_v45 = vmul.f32 0.5, %v273_v38  ;;  %v309_v51 = vmul.f32 %v307_v20, %v252_v21  ;;  %s420_s16 = sadd.s32 (%p1007_p7), %s608_s8, %s601_s28 }
  0x4e   : > { %v312_v52 = vmul.f32 %v594_v29, %v310_v25  ;;  %v271_v53 = vadd.f32 %v269_v43, %v266_v46  ;;  %v290_v54 = vadd.f32 %v288_v47, %v285_v44  ;;  %v317_v55 = vmul.f32 %v596_v33, %v315_v32  ;;  %s602_s19 = sshll.u32 (%p1007_p7), %s420_s16, 3 }
  0x4f   : > { %v299_v49 = vmul.f32 0.5, %v297_v41  ;;  %v321_v50 = vadd.f32 %v320_v39, %v318_v42  ;;  %676 = vtanh.f32 %v275_v45  ;;  %v331_v6 = vstv %s933_s23 }
  0x50   : > { %v314_v57 = vadd.f32 %v312_v52, %v309_v51  ;;  %v274_v58 = vadd.f32 %v272_v26, %v271_v53  ;;  %v295_v59 = vadd.f32 %v293_v48, %v290_v54  ;;  %v357_v7 = vstv %s937_s27 }
  0x51   : > { %678 = vtanh.f32 %v299_v49  ;;  %v323_v56 = vmul.f32 0.5, %v321_v50  ;;  %v384_v8 = vstv %s939_s21  ;;  %v334_v11 = vstv %s935_s24  ;;  %s422_s24 = scalar_lea.vmem (%p1007_p7), %s1000_s2, %s602_s19 }
  0x52   : > { %v319_v60 = vadd.f32 %v317_v55, %v314_v57  ;;  %v276_v61 = vmul.f32 0.5, %v274_v58  ;;  %v298_v62 = vadd.f32 %v296_v31, %v295_v59  ;;  %v360_v12 = vstv %s941_s29 }
  0x53   : > { %680 = vtanh.f32 %v323_v56  ;;  %v387_v13 = vstv %s943_s3  ;;  %v339_v16 = vstv %s945_s25  ;;  %v365_v17 = vstv %s947_s9 }
  0x54   : > { %v322_v63 = vadd.f32 %v320_v39, %v319_v60  ;;  %682 = vtanh.f32 %v276_v61  ;;  %v300_v0 = vmul.f32 0.5, %v298_v62  ;;  %v392_v21 = vstv %s949_s4 }
  0x55   : > { %v344_v27 = vstv %s951_s5  ;;  %v370_v29 = vstv %s953_s6  ;;  %v397_v43 = vstv %s957_s26 }
  0x56   : > { %v324_v1 = vmul.f32 0.5, %v322_v63  ;;  %684 = vtanh.f32 %v300_v0 }
  0x58   : > { %686 = vtanh.f32 %v324_v1 }
  0x59   : > { %v677_v2 = vpop.eup %676 }
  0x5a   : > { %v279_v4 = vmul.f32 0.5, %v677_v2 }
  0x5b   : > { %v679_v3 = vpop.eup %678 }
  0x5c   : > { %v303_v5 = vmul.f32 0.5, %v679_v3  ;;  %v281_v10 = vadd.f32 0.5, %v279_v4 }
  0x5d   : > { %v681_v9 = vpop.eup %680 }
  0x5e   : > { %v305_v14 = vadd.f32 0.5, %v303_v5  ;;  %v327_v15 = vmul.f32 0.5, %v681_v9  ;;  %v332_v18 = vmul.f32 %v331_v6, %v281_v10  ;;  %v358_v19 = vmul.f32 %v357_v7, %v281_v10  ;;  %v683_v22 = vpop.eup %682 }
  0x5f   : > { %v385_v20 = vmul.f32 %v384_v8, %v281_v10  ;;  %v280_v28 = vmul.f32 0.5, %v683_v22 }
  0x60   : > { %v329_v23 = vadd.f32 0.5, %v327_v15  ;;  %v335_v24 = vmul.f32 %v334_v11, %v305_v14  ;;  %v361_v25 = vmul.f32 %v360_v12, %v305_v14  ;;  %v388_v26 = vmul.f32 %v387_v13, %v305_v14  ;;  %v685_v30 = vpop.eup %684 }
  0x61   : > { %v282_v36 = vadd.f32 0.5, %v280_v28  ;;  %v304_v37 = vmul.f32 0.5, %v685_v30 }
  0x62   : > { %v337_v31 = vadd.f32 %v335_v24, %v332_v18  ;;  %v340_v32 = vmul.f32 %v339_v16, %v329_v23  ;;  %v363_v33 = vadd.f32 %v361_v25, %v358_v19  ;;  %v366_v34 = vmul.f32 %v365_v17, %v329_v23  ;;  %v687_v35 = vpop.eup %686 }
  0x63   : > { %v390_v38 = vadd.f32 %v388_v26, %v385_v20  ;;  %v393_v39 = vmul.f32 %v392_v21, %v329_v23  ;;  %v328_v41 = vmul.f32 0.5, %v687_v35  ;;  %v306_v44 = vadd.f32 0.5, %v304_v37 }
  0x64   : > { %v342_v40 = vadd.f32 %v340_v32, %v337_v31  ;;  %v368_v42 = vadd.f32 %v366_v34, %v363_v33  ;;  %v333_v45 = vmul.f32 %v331_v6, %v282_v36  ;;  %v359_v46 = vmul.f32 %v357_v7, %v282_v36 }
  0x65   : > { %v395_v47 = vadd.f32 %v393_v39, %v390_v38  ;;  %v330_v49 = vadd.f32 0.5, %v328_v41  ;;  %v386_v51 = vmul.f32 %v384_v8, %v282_v36  ;;  %v336_v52 = vmul.f32 %v334_v11, %v306_v44 }
  0x66   : > { %v345_v48 = vadd.f32 %v344_v27, %v342_v40  ;;  %v371_v50 = vadd.f32 %v370_v29, %v368_v42  ;;  %v362_v53 = vmul.f32 %v360_v12, %v306_v44  ;;  %v389_v55 = vmul.f32 %v387_v13, %v306_v44 }
  0x67   : > { %v398_v54 = vadd.f32 %v397_v43, %v395_v47  ;;  %v341_v57 = vmul.f32 %v339_v16, %v330_v49  ;;  %v367_v59 = vmul.f32 %v365_v17, %v330_v49  ;;  %v338_v60 = vadd.f32 %v336_v52, %v333_v45 }
  0x68   : > { %v347_v56 = vmul.f32 0.5, %v345_v48  ;;  %v373_v58 = vmul.f32 0.5, %v371_v50  ;;  %v364_v61 = vadd.f32 %v362_v53, %v359_v46  ;;  %v391_v63 = vadd.f32 %v389_v55, %v386_v51 }
  0x69   : > { %v400_v62 = vmul.f32 0.5, %v398_v54  ;;  %v394_v0 = vmul.f32 %v392_v21, %v330_v49  ;;  %v343_v1 = vadd.f32 %v341_v57, %v338_v60 }
  0x6a   : > { %688 = vtanh.f32 %v347_v56  ;;  %v369_v2 = vadd.f32 %v367_v59, %v364_v61 }
  0x6b   : > { %690 = vtanh.f32 %v373_v58  ;;  %v396_v3 = vadd.f32 %v394_v0, %v391_v63  ;;  %v346_v4 = vadd.f32 %v344_v27, %v343_v1 }
  0x6c   : > { %692 = vtanh.f32 %v400_v62  ;;  %v372_v5 = vadd.f32 %v370_v29, %v369_v2 }
  0x6d   : > { %v399_v6 = vadd.f32 %v397_v43, %v396_v3  ;;  %v348_v7 = vmul.f32 0.5, %v346_v4 }
  0x6e   : > { %v374_v8 = vmul.f32 0.5, %v372_v5 }
  0x6f   : > { %v401_v9 = vmul.f32 0.5, %v399_v6  ;;  %694 = vtanh.f32 %v348_v7 }
  0x70   : > { %696 = vtanh.f32 %v374_v8 }
  0x71   : > { %698 = vtanh.f32 %v401_v9 }
  0x74   : > { %v689_v10 = vpop.eup %688 }
  0x75   : > { %v691_v11 = vpop.eup %690  ;;  %v351_v12 = vmul.f32 0.5, %v689_v10 }
  0x76   : > { %v693_v13 = vpop.eup %692  ;;  %v377_v14 = vmul.f32 0.5, %v691_v11 }
  0x77   : > { %v353_v15 = vadd.f32 0.5, %v351_v12  ;;  %v404_v16 = vmul.f32 0.5, %v693_v13 }
  0x78   : > { %v379_v17 = vadd.f32 0.5, %v377_v14 }
  0x79   : > { %355 = vst [vmem:[%s224_s7] sm:$0xff] %v353_v15  ;;  %v406_v18 = vadd.f32 0.5, %v404_v16  ;;  %v695_v19 = vpop.eup %694 }
  0x7a   : > { %597 = vst [vmem:[%s224_s7 + $0x10] sm:$0xff] %v379_v17  ;;  %v697_v20 = vpop.eup %696  ;;  %v352_v21 = vmul.f32 0.5, %v695_v19  ;;  %417 = sbr.rel (!%p1007_p7) target bundleno = 137 (0x89), region = 74 }
  0x7b   : > { %599 = vst [vmem:[%s224_s7 + $0x20] sm:$0xff] %v406_v18  ;;  %v699_v22 = vpop.eup %698  ;;  %v378_v23 = vmul.f32 0.5, %v697_v20 }
  0x7c   : > { %v354_v24 = vadd.f32 0.5, %v352_v21  ;;  %v405_v25 = vmul.f32 0.5, %v699_v22 }
  0x7d   : > { %v380_v26 = vadd.f32 0.5, %v378_v23 }
  0x7e   : > { %356 = vst [vmem:[%s224_s7 + $0x8] sm:$0xff] %v354_v24  ;;  %v407_v27 = vadd.f32 0.5, %v405_v25 }
  0x7f   : > { %598 = vst [vmem:[%s224_s7 + $0x18] sm:$0xff] %v380_v26 }
  0x80   : > { %600 = vst [vmem:[%s224_s7 + $0x28] sm:$0xff] %v407_v27  ;;  %v460_v28 = vld [vmem:[%s224_s7] sm:$0xff] (%p1007_p7) }
  0x81   : > { %v464_v30 = vld [vmem:[%s224_s7 + $0x10] sm:$0xff]  ;;  %461 = vst [vmem:[%s422_s24] sm:$0xff] %v460_v28 }
  0x82   : > { %v468_v32 = vld [vmem:[%s224_s7 + $0x20] sm:$0xff]  ;;  %465 = vst [vmem:[%s422_s24 + $0x20] sm:$0xff] %v464_v30 }
  0x83   : > { %469 = vst [vmem:[%s422_s24 + $0x40] sm:$0xff] %v468_v32 }
  0x85   : > { %v462_v29 = vld [vmem:[%s224_s7 + $0x8] sm:$0xff] }
  0x86   : > { %v466_v31 = vld [vmem:[%s224_s7 + $0x18] sm:$0xff]  ;;  %463 = vst [vmem:[%s422_s24 + $0x8] sm:$0xff] %v462_v29 }
  0x87   : > { %v470_v33 = vld [vmem:[%s224_s7 + $0x28] sm:$0xff]  ;;  %467 = vst [vmem:[%s422_s24 + $0x28] sm:$0xff] %v466_v31 }
  0x88   : > { %471 = vst [vmem:[%s422_s24 + $0x48] sm:$0xff] %v470_v33 }
  0x89 PF: > { %s13_s15 = sadd.s32 1, %s773_s15   ;;  %s1008_s9 = smov %s753_s10 }
  0x8a   : > { %p10_p9 = scmp.ge.s32.totalorder %s13_s15, 6   ;;  %s1009_s10 = smov %s866_s30 }
  0x8b   : > { %s1010_s11 = smov %s765_s13  ;;  %s1011_s12 = smov %s769_s14 }
  0x8c   : > { %s1012_s13 = smov %s1015_s17  ;;  %s1013_s14 = smov %s1019_s18 }
  0x8d   :  { %12 = sbr.rel (!%p10_p9) target bundleno = 4 (0x4), region = 148 }
  0x94   :  { %487 = vsyncpa [#allocation4], 1 }
  0x95   :  { %489 = vsyncpa [#allocation4 + $0x1], 1 }

</bundles_post_ra>
